<compile_context>
chip_gen: v7x
topology: tpu7x:2x2x1
jax: 0.10.0
libtpu: 0.0.40
codegen_flags: <defaults>
</compile_context>

<pallas_src>
import functools

import jax
import jax.numpy as jnp
from jax.experimental import pallas as pl
from jax.experimental.pallas import tpu as pltpu


def _ema_crossen1_kernel(s0_ref, s1_ref, out_ref, acc_ref, *, inv_count):
    i = pl.program_id(0)

    @pl.when(i == 0)
    def _():
        acc_ref[...] = jnp.zeros_like(acc_ref)

    s0 = s0_ref[...].astype(jnp.float32)
    s1 = s1_ref[...].astype(jnp.float32)

    # Row-wise log-sum-exp of sim0 (log_softmax denominator), shape (R, 1).
    m0 = jnp.max(s0, axis=-1, keepdims=True)
    lse0 = m0 + jnp.log(jnp.sum(jnp.exp(s0 - m0), axis=-1, keepdims=True))

    # Unnormalized softmax weights of sim1.
    m1 = jnp.max(s1, axis=-1, keepdims=True)
    e1 = jnp.exp(s1 - m1)
    sum_e1 = jnp.sum(e1, axis=-1, keepdims=True)          # (R, 1)
    w = jnp.sum(e1 * s0, axis=-1, keepdims=True)          # (R, 1)

    # Per-row loss: lse0 - weighted mean of s0 under softmax(sim1).
    # (Division is per-row, O(R), so exact divide is essentially free.)
    acc_ref[...] += lse0 - w / sum_e1

    @pl.when(i == pl.num_programs(0) - 1)
    def _():
        out_ref[0, 0] = jnp.sum(acc_ref[...]) * jnp.float32(inv_count)


def _pick_row_tile(n, m, itemsize, vmem_budget_bytes=32 << 20):
    """Largest row tile (divisor of n, multiple of 8) whose double-buffered
    input blocks fit the VMEM budget; small inputs use a single block."""
    per_row_bytes = 2 * 2 * m * itemsize          # 2 inputs x 2 pipeline bufs
    max_rows = max(8, vmem_budget_bytes // max(per_row_bytes, 1))
    if n <= max_rows:
        return n                                   # whole matrix, grid=(1,)
    if n % 8 != 0:
        # TODO(synk): pad ragged row counts; fall back to one (large) block.
        return n
    best = 8
    t = 8
    while t <= max_rows:
        if n % t == 0:
            best = t
        t += 8
    return best


def ema_crossen1(sim_matrix0, sim_matrix1, *, row_tile=None):
    assert sim_matrix0.shape == sim_matrix1.shape
    assert sim_matrix0.ndim == 2
    n, m = sim_matrix0.shape
    itemsize = jnp.dtype(sim_matrix0.dtype).itemsize

    if row_tile is None:
        row_tile = _pick_row_tile(n, m, itemsize)
    assert n % row_tile == 0, "row count must be divisible by row_tile"

    # Raise the scoped VMEM limit to cover the double-buffered input blocks
    # (stays <= 56 MiB so it also fits v7x's 64 MiB physical VMEM).
    buf_bytes = 2 * 2 * row_tile * m * itemsize
    vmem_limit = int(min(max(32 << 20, buf_bytes + (8 << 20)), 56 << 20))

    kernel = functools.partial(
        _ema_crossen1_kernel, inv_count=1.0 / float(n * m)
    )

    out = pl.pallas_call(
        kernel,
        out_shape=jax.ShapeDtypeStruct((1, 1), jnp.float32),
        grid_spec=pltpu.PrefetchScalarGridSpec(
            num_scalar_prefetch=0,
            grid=(n // row_tile,),
            in_specs=[
                pl.BlockSpec((row_tile, m), lambda i: (i, 0)),
                pl.BlockSpec((row_tile, m), lambda i: (i, 0)),
            ],
            out_specs=pl.BlockSpec(memory_space=pltpu.SMEM),
            scratch_shapes=[pltpu.VMEM((row_tile, 1), jnp.float32)],
        ),
        compiler_params=pltpu.CompilerParams(
            dimension_semantics=("arbitrary",),  # output/scratch accumulate
            vmem_limit_bytes=vmem_limit,
        ),
    )(sim_matrix0, sim_matrix1)
    return out[0, 0]


def _reference(sim_matrix0, sim_matrix1):
    logpt0 = jax.nn.log_softmax(sim_matrix0.astype(jnp.float32), axis=-1)
    pt1 = jax.nn.softmax(sim_matrix1.astype(jnp.float32), axis=-1)
    return jnp.mean(-logpt0 * pt1)


if __name__ == "__main__":
    key = jax.random.PRNGKey(0)
    k0, k1 = jax.random.split(key)

    # Case 1: small similarity matrices (single-block path, grid=(1,)).
    sim0 = jax.random.normal(k0, (16, 32), dtype=jnp.float32)
    sim1 = jax.random.normal(k1, (16, 32), dtype=jnp.float32)
    loss = jax.block_until_ready(ema_crossen1(sim0, sim1))
    ref = _reference(sim0, sim1)
    assert jnp.allclose(loss, ref, rtol=1e-5, atol=1e-6), (loss, ref)

    # Case 2: force a multi-step grid to exercise the VMEM accumulator path.
    sim0b = jax.random.normal(k0, (64, 256), dtype=jnp.float32)
    sim1b = jax.random.normal(k1, (64, 256), dtype=jnp.float32)
    loss_b = jax.block_until_ready(ema_crossen1(sim0b, sim1b, row_tile=16))
    ref_b = _reference(sim0b, sim1b)
    assert jnp.allclose(loss_b, ref_b, rtol=1e-5, atol=1e-6), (loss_b, ref_b)

    print("KERNEL_OK")
</pallas_src>

<mosaic_0001>
module attributes {stable_mosaic.version = 11 : i64} {
  func.func @_ema_crossen1_kernel(%arg0: i32, %arg1: memref<16x32xf32, #tpu.memory_space<vmem>>, %arg2: memref<16x32xf32, #tpu.memory_space<vmem>>, %arg3: memref<1x1xf32, #tpu.memory_space<smem>>, %arg4: memref<16x1xf32, #tpu.memory_space<vmem>>) attributes {dimension_semantics = [#tpu.dimension_semantics<arbitrary>], iteration_bounds = array<i64: 1>, scalar_prefetch = 0 : i64, scratch_operands = 1 : i64, tpu.core_type = #tpu.core_type<tc>, window_params = [{transform_indices = @transform_0, window_bounds = array<i64: 16, 32>}, {transform_indices = @transform_1, window_bounds = array<i64: 16, 32>}, {transform_indices = @transform_2, window_bounds = array<i64: 1, 1>}]} {
    %c0_i32 = arith.constant 0 : i32
    %0 = arith.cmpi eq, %arg0, %c0_i32 : i32
    %1 = arith.extui %0 : i1 to i32
    %c0_i32_0 = arith.constant 0 : i32
    %2 = arith.cmpi ne, %1, %c0_i32_0 : i32
    scf.if %2 {
      %cst_14 = arith.constant 0.000000e+00 : f32
      %32 = vector.broadcast %cst_14 : f32 to vector<16x1xf32>
      %c0_15 = arith.constant 0 : index
      %c0_16 = arith.constant 0 : index
      %33 = vector.load %arg4[%c0_15, %c0_16] : memref<16x1xf32, #tpu.memory_space<vmem>>, vector<16x1xf32>
      tpu.vector_store %arg4[%c0_15, %c0_16], %32 {strides = array<i32>} : memref<16x1xf32, #tpu.memory_space<vmem>>, vector<16x1xf32>,
    } else {
    }
    %c0 = arith.constant 0 : index
    %c0_1 = arith.constant 0 : index
    %3 = vector.load %arg1[%c0, %c0_1] : memref<16x32xf32, #tpu.memory_space<vmem>>, vector<16x32xf32>
    %c0_2 = arith.constant 0 : index
    %c0_3 = arith.constant 0 : index
    %4 = vector.load %arg2[%c0_2, %c0_3] : memref<16x32xf32, #tpu.memory_space<vmem>>, vector<16x32xf32>
    %cst = arith.constant dense<0xFF800000> : vector<16xf32>
    %5 = vector.multi_reduction <maximumf>, %3, %cst [1] : vector<16x32xf32> to vector<16xf32>
    %6 = vector.shape_cast %5 : vector<16xf32> to vector<16x1xf32>
    %7 = vector.broadcast %6 : vector<16x1xf32> to vector<16x32xf32>
    %8 = arith.subf %3, %7 : vector<16x32xf32>
    %9 = math.exp %8 : vector<16x32xf32>
    %cst_4 = arith.constant dense<0.000000e+00> : vector<16xf32>
    %10 = vector.multi_reduction <add>, %9, %cst_4 [1] : vector<16x32xf32> to vector<16xf32>
    %11 = vector.shape_cast %10 : vector<16xf32> to vector<16x1xf32>
    %12 = math.log %11 : vector<16x1xf32>
    %13 = arith.addf %6, %12 : vector<16x1xf32>
    %cst_5 = arith.constant dense<0xFF800000> : vector<16xf32>
    %14 = vector.multi_reduction <maximumf>, %4, %cst_5 [1] : vector<16x32xf32> to vector<16xf32>
    %15 = vector.shape_cast %14 : vector<16xf32> to vector<16x1xf32>
    %16 = vector.broadcast %15 : vector<16x1xf32> to vector<16x32xf32>
    %17 = arith.subf %4, %16 : vector<16x32xf32>
    %18 = math.exp %17 : vector<16x32xf32>
    %cst_6 = arith.constant dense<0.000000e+00> : vector<16xf32>
    %19 = vector.multi_reduction <add>, %18, %cst_6 [1] : vector<16x32xf32> to vector<16xf32>
    %20 = vector.shape_cast %19 : vector<16xf32> to vector<16x1xf32>
    %21 = arith.mulf %18, %3 : vector<16x32xf32>
    %cst_7 = arith.constant dense<0.000000e+00> : vector<16xf32>
    %22 = vector.multi_reduction <add>, %21, %cst_7 [1] : vector<16x32xf32> to vector<16xf32>
    %23 = vector.shape_cast %22 : vector<16xf32> to vector<16x1xf32>
    %c0_8 = arith.constant 0 : index
    %c0_9 = arith.constant 0 : index
    %24 = vector.load %arg4[%c0_8, %c0_9] : memref<16x1xf32, #tpu.memory_space<vmem>>, vector<16x1xf32>
    %25 = arith.divf %23, %20 : vector<16x1xf32>
    %26 = arith.subf %13, %25 : vector<16x1xf32>
    %27 = arith.addf %24, %26 : vector<16x1xf32>
    %c0_10 = arith.constant 0 : index
    %c0_11 = arith.constant 0 : index
    %28 = vector.load %arg4[%c0_10, %c0_11] : memref<16x1xf32, #tpu.memory_space<vmem>>, vector<16x1xf32>
    tpu.vector_store %arg4[%c0_10, %c0_11], %27 {strides = array<i32>} : memref<16x1xf32, #tpu.memory_space<vmem>>, vector<16x1xf32>,
    %c0_i32_12 = arith.constant 0 : i32
    %29 = arith.cmpi eq, %arg0, %c0_i32_12 : i32
    %30 = arith.extui %29 : i1 to i32
    %c0_i32_13 = arith.constant 0 : i32
    %31 = arith.cmpi ne, %30, %c0_i32_13 : i32
    scf.if %31 {
      %c0_14 = arith.constant 0 : index
      %c0_15 = arith.constant 0 : index
      %32 = vector.load %arg4[%c0_14, %c0_15] : memref<16x1xf32, #tpu.memory_space<vmem>>, vector<16x1xf32>
      %33 = vector.shape_cast %32 : vector<16x1xf32> to vector<1x16x1xf32>
      %cst_16 = arith.constant dense<0.000000e+00> : vector<1xf32>
      %34 = vector.multi_reduction <add>, %33, %cst_16 [1, 2] : vector<1x16x1xf32> to vector<1xf32>
      %35 = vector.shape_cast %34 : vector<1xf32> to vector<1x1x1xf32>
      %36 = vector.extract %35[0, 0, 0] : f32 from vector<1x1x1xf32>
      %cst_17 = arith.constant 0.001953125 : f32
      %37 = arith.mulf %36, %cst_17 : f32
      %c0_18 = arith.constant 0 : index
      %c0_19 = arith.constant 0 : index
      %38 = memref.load %arg3[%c0_18, %c0_19] : memref<1x1xf32, #tpu.memory_space<smem>>
      memref.store %37, %arg3[%c0_18, %c0_19] : memref<1x1xf32, #tpu.memory_space<smem>>
    } else {
    }
    return
  }
  func.func @transform_0(%arg0: i32) -> (i32, i32) {
    %c0_i32 = arith.constant 0 : i32
    %c0_i32_0 = arith.constant 0 : i32
    return %arg0, %c0_i32 : i32, i32
  }
  func.func @transform_1(%arg0: i32) -> (i32, i32) {
    %c0_i32 = arith.constant 0 : i32
    %c0_i32_0 = arith.constant 0 : i32
    return %arg0, %c0_i32 : i32, i32
  }
  func.func @transform_2(%arg0: i32) -> (i32, i32) {
    %c0_i32 = arith.constant 0 : i32
    %c0_i32_0 = arith.constant 0 : i32
    %c0_i32_1 = arith.constant 0 : i32
    return %c0_i32, %c0_i32_0 : i32, i32
  }
}

</mosaic_0001>

<bundles_post_ra>
// kernel: tpu_custom_call.1
= control target key start
LH: loop header
LB: loop body
LE: loop exit
PB: predicated region body
PF: predicated region fallthrough
CT: control target
= control target key end

     0   :  { %7 = vsyncpa [#allocation4], 0  ;;  %s307_s0 = inlined_call_operand.hbm [shape: f32[16,32], index: 0, kind: input, shape index: {}]   ;;  %s308_s1 = inlined_call_operand.hbm [shape: f32[16,32], index: 1, kind: input, shape index: {}]   ;;  %s309_s2 = inlined_call_operand.hbm [shape: f32[1,1], index: 2, kind: output, shape index: {}]  }
   0x1   :  { %8 = vsyncpa [#allocation7], 0 }
   0x2   :  { %9 = vsyncpa [#allocation5], 0  ;;  %s234_s9 = smov [#allocation3]   ;;  %s174_s13 = scalar_lea.hbm %s307_s0, 256 }
   0x3   :  { %s15_s10 = sshll.u32 %s234_s9, 4  ;;  %p175_p0 = scmp.ne.s32.totalorder %s307_s0, %s174_s13  ;;  %s16_s10 = int_to_ptr.vmem [resolvable:$true] %s15_s10 }
   0x4   :  { %p178_p1 = scmp.lt.u32.totalorder %s174_s13, %s307_s0 }
   0x6   :  { %p180_p2 = pnand %p178_p1, %p175_p0 }
   0x8   :  { %183 = shalt.err (!%p180_p2)
}
   0x9   :  { %s184_s18 = scalar_lea.vmem %s16_s10, 256  ;;  %p189_p4 = scmp.lt.s32.totalorder %s16_s10, %s16_s10 }
   0xa   :  { %p185_p3 = scmp.ne.s32.totalorder %s16_s10, %s184_s18  ;;  %p190_p5 = scmp.lt.s32.totalorder %s184_s18, %s184_s18 }
   0xc   :  { %p191_p6 = por %p190_p5, %p189_p4 }
   0xe   :  { %p192_p7 = pnand %p191_p6, %p185_p3 }
  0x10   :  { %195 = shalt.err (!%p192_p7)
}
  0x11   :  { %s235_s19 = smov 128   ;;  %s236_s20 = smov 8  }
  0x12   :  { %21 = dma.hbm_to_vmem [thread:$0]  %s307_s0, 256, %s16_s10, [#allocation4], %s235_s19, %s235_s19, %s236_s20  }
  0x13   :  { %s237_s23 = smov [#allocation6]   ;;  %s196_s27 = scalar_lea.hbm %s308_s1, 256 }
  0x14   :  { %s27_s24 = sshll.u32 %s237_s23, 4  ;;  %p197_p8 = scmp.ne.s32.totalorder %s308_s1, %s196_s27  ;;  %s28_s24 = int_to_ptr.vmem [resolvable:$true] %s27_s24 }
  0x15   :  { %p200_p9 = scmp.lt.u32.totalorder %s196_s27, %s308_s1 }
  0x17   :  { %p202_p10 = pnand %p200_p9, %p197_p8 }
  0x19   :  { %205 = shalt.err (!%p202_p10)
}
  0x1a   :  { %s206_s4 = scalar_lea.vmem %s28_s24, 256  ;;  %p211_p12 = scmp.lt.s32.totalorder %s28_s24, %s28_s24 }
  0x1b   :  { %p207_p11 = scmp.ne.s32.totalorder %s28_s24, %s206_s4  ;;  %p212_p13 = scmp.lt.s32.totalorder %s206_s4, %s206_s4 }
  0x1d   :  { %p213_p0 = por %p212_p13, %p211_p12 }
  0x1f   :  { %p214_p1 = pnand %p213_p0, %p207_p11 }
  0x21   :  { %217 = shalt.err (!%p214_p1)
}
  0x22   :  { %33 = dma.hbm_to_vmem [thread:$0]  %s308_s1, 256, %s28_s24, [#allocation7], %s235_s19, %s235_s19, %s236_s20  }
  0x23   :  { %228 = dma.done.wait [#allocation4], 256  }
  0x24   :  { %229 = vsyncadd [#allocation4], 4294967040 }
  0x25   :  { %230 = dma.done.wait [#allocation7], 256  }
  0x26   :  { %231 = vsyncadd [#allocation7], 4294967040  ;;  %vm51_vm0 = vcmask 261120   ;;  %v47_v0 = vld [vmem:[#allocation3] sm:$0xff]  ;;  %v49_v1 = vld [vmem:[#allocation6] sm:$0xff]  ;;  %vm44_vm1 = vcmask 7168  }
  0x27   :  { %v48_v2 = vld [vmem:[#allocation3 + $0x8] sm:$0xff]  ;;  %v52_v3 = vsel %vm51_vm0, %v47_v0, -inf  ;;  %v76_v4 = vsel %vm51_vm0, %v49_v1, -inf  ;;  %v50_v5 = vld [vmem:[#allocation6 + $0x8] sm:$0xff]  ;;  %v238_v32 = vmov 0.0   ;;  %s218_s9 = scalar_lea.hbm %s309_s2, 16 }
  0x28   :  { %53 = vmax.xlane.f32.xlu0 %v52_v3  ;;  %77 = vmax.xlane.f32.xlu1 %v76_v4  ;;  %v55_v6 = vsel %vm51_vm0, %v48_v2, -inf  ;;  %v79_v7 = vsel %vm51_vm0, %v50_v5, -inf  ;;  %45 = vst.msk [vmem:[#allocation2] sm:$0xff] %vm44_vm1, %v238_v32  ;;  %46 = vst.msk [vmem:[#allocation2 + $0x8] sm:$0xff] %vm44_vm1, %v238_v32  ;;  %p219_p2 = scmp.ne.s32.totalorder %s309_s2, %s218_s9  ;;  %p222_p3 = scmp.lt.u32.totalorder %s218_s9, %s309_s2 }
  0x2a   :  { %p224_p4 = pnand %p222_p3, %p219_p2 }
  0x2c   :  { %56 = vmax.xlane.f32.xlu0 %v55_v6  ;;  %80 = vmax.xlane.f32.xlu1 %v79_v7 }
  0x2f   :  { %v102_v45 = vld [vmem:[#allocation2] sm:$0xff]  ;;  %v103_v52 = vld [vmem:[#allocation2 + $0x8] sm:$0xff] }
  0xb5   :  { %v54_v8 = vpop.xlane.xlu0 %53  ;;  %v78_v9 = vpop.xlane.xlu1 %77 }
  0xb6   :  { %v58_v10 = vsub.f32 %v47_v0, %v54_v8  ;;  %v82_v11 = vsub.f32 %v49_v1, %v78_v9 }
  0xb8   :  { %v60_v12 = vmul.f32 1.442695, %v58_v10  ;;  %v84_v13 = vmul.f32 1.442695, %v82_v11 }
  0xb9   :  { %v57_v14 = vpop.xlane.xlu0 %56  ;;  %v81_v15 = vpop.xlane.xlu1 %80 }
  0xba   :  { %158 = vpow2.f32 %v60_v12  ;;  %v59_v16 = vsub.f32 %v48_v2, %v57_v14  ;;  %v83_v17 = vsub.f32 %v50_v5, %v81_v15 }
  0xbb   :  { %160 = vpow2.f32 %v84_v13 }
  0xbc   :  { %v62_v18 = vmul.f32 1.442695, %v59_v16  ;;  %v86_v19 = vmul.f32 1.442695, %v83_v17 }
  0xbe   :  { %162 = vpow2.f32 %v62_v18 }
  0xbf   :  { %164 = vpow2.f32 %v86_v19 }
  0xc4   :  { %v159_v20 = vpop.eup %158 }
  0xc5   :  { %v161_v21 = vpop.eup %160  ;;  %v64_v22 = vsel %vm51_vm0, %v159_v20, 0.0 }
  0xc6   :  { %65 = vadd.xlane.f32.xlu0 %v64_v22  ;;  %v88_v23 = vsel %vm51_vm0, %v161_v21, 0.0  ;;  %v94_v27 = vmul.f32 %v161_v21, %v47_v0 }
  0xc8   :  { %v163_v24 = vpop.eup %162  ;;  %v96_v29 = vsel %vm51_vm0, %v94_v27, 0.0 }
  0xc9   :  { %v165_v25 = vpop.eup %164  ;;  %v67_v26 = vsel %vm51_vm0, %v163_v24, 0.0 }
  0xca   :  { %89 = vadd.xlane.f32.xlu0 %v88_v23  ;;  %68 = vadd.xlane.f32.xlu1 %v67_v26  ;;  %v91_v28 = vsel %vm51_vm0, %v165_v25, 0.0  ;;  %v95_v30 = vmul.f32 %v165_v25, %v48_v2 }
  0xcc   :  { %v99_v31 = vsel %vm51_vm0, %v95_v30, 0.0 }
  0xce   :  { %97 = vadd.xlane.f32.xlu0 %v96_v29  ;;  %92 = vadd.xlane.f32.xlu1 %v91_v28 }
  0xd2   :  { %100 = vadd.xlane.f32.xlu1 %v99_v31 }
 0x153   :  { %v66_v33 = vpop.xlane.xlu0 %65 }
 0x154   :  { %166 = vlog2.f32 %v66_v33 }
 0x157   :  { %v69_v34 = vpop.xlane.xlu1 %68  ;;  %v90_v35 = vpop.xlane.xlu0 %89 }
 0x158   :  { %168 = vlog2.f32 %v69_v34 }
 0x159   :  { %170 = vrcp.f32 %v90_v35 }
 0x15b   :  { %v93_v36 = vpop.xlane.xlu1 %92  ;;  %v98_v42 = vpop.xlane.xlu0 %97 }
 0x15c   :  { %172 = vrcp.f32 %v93_v36 }
 0x15e   :  { %v167_v37 = vpop.eup %166 }
 0x15f   :  { %v71_v38 = vmul.f32 0.6931472, %v167_v37  ;;  %v101_v48 = vpop.xlane.xlu1 %100 }
 0x161   :  { %v74_v43 = vadd.f32 %v71_v38, %v54_v8 }
 0x162   :  { %v169_v39 = vpop.eup %168 }
 0x163   :  { %v171_v40 = vpop.eup %170  ;;  %v73_v41 = vmul.f32 0.6931472, %v169_v39 }
 0x164   :  { %v105_v44 = vmul.f32 %v171_v40, %v98_v42 }
 0x165   :  { %v75_v49 = vadd.f32 %v73_v41, %v57_v14 }
 0x166   :  { %v173_v46 = vpop.eup %172  ;;  %v108_v47 = vsub.f32 %v74_v43, %v105_v44 }
 0x167   :  { %v107_v50 = vmul.f32 %v173_v46, %v101_v48 }
 0x168   :  { %v110_v51 = vadd.f32 %v108_v47, %v102_v45 }
 0x169   :  { %v109_v53 = vsub.f32 %v75_v49, %v107_v50 }
 0x16a   :  { %113 = vst.msk [vmem:[#allocation2] sm:$0xff] %vm44_vm1, %v110_v51 }
 0x16b   :  { %v111_v54 = vadd.f32 %v109_v53, %v103_v52 }
 0x16d   :  { %114 = vst.msk [vmem:[#allocation2 + $0x8] sm:$0xff] %vm44_vm1, %v111_v54 }
 0x171   :  { %v118_v55 = vld [vmem:[#allocation2] sm:$0xff] }
 0x172   :  { %v120_v57 = vsel %vm44_vm1, %v118_v55, 0.0 }
 0x174   :  { %v119_v56 = vld [vmem:[#allocation2 + $0x8] sm:$0xff] }
 0x175   :  { %v121_v58 = vsel %vm44_vm1, %v119_v56, 0.0 }
 0x176   :  { %v122_v59 = vadd.f32 %v121_v58, %v120_v57 }
 0x178   :  { %123 = vadd.xlane.f32.xlu0 %v122_v59 }
 0x205   :  { %v124_v60 = vpop.xlane.xlu0 %123 }
 0x206   :  { %v125_v61 = vrot.slane %v124_v60, 4 }
 0x208   :  { %v126_v62 = vadd.f32 %v125_v61, %v124_v60 }
 0x20a   :  { %v127_v63 = vrot.slane %v126_v62, 2 }
 0x20c   :  { %v128_v0 = vadd.f32 %v127_v63, %v126_v62 }
 0x20e   :  { %v129_v1 = vrot.slane %v128_v0, 1 }
 0x210   :  { %v130_v2 = vadd.f32 %v129_v1, %v128_v0 }
 0x212   :  { %150 = vpush %v130_v2 }
 0x243   :  { %s151_s1 = spop %150 }
 0x244   :  { %s132_s6 = smul.f32 0.001953125, %s151_s1 }
 0x246   :  { %134 = sst [smem:[#allocation8]] %s132_s6 }
 0x247   :  { %227 = shalt.err (!%p224_p4)
}
 0x248   :  { %s239_s14 = smov [#allocation8]  }
 0x249   :  { %142 = dma.smem_to_hbm %s239_s14, 16, %s309_s2, [#allocation5]  }
 0x24a   :  { %232 = dma.done.wait [#allocation5], 16  }
 0x24b   :  { %233 = vsyncadd [#allocation5], 4294967280 }
 0x24c   :  { %146 = sfence }
 0x24d   :  { %147 = vsyncpa [#allocation4], 1 }
 0x24e   :  { %148 = vsyncpa [#allocation7], 1 }
 0x24f   :  { %149 = vsyncpa [#allocation5], 1 }

</bundles_post_ra>
